<compile_context>
chip_gen: v5e
topology: v5e:2x2
jax: 0.10.0
libtpu: 0.0.40
codegen_flags: <defaults>
</compile_context>

<pallas_src>
import functools

import jax
import jax.numpy as jnp
from jax.experimental import pallas as pl
from jax.experimental.pallas import tpu as pltpu

H_LAYER1 = 50
H_LAYER2 = 10
H_LAYER3 = 10
H_LAYER4 = 10

_LANE = 128   # padded feature width for every layer (all logical widths <= 50)
_SUB = 8      # sublane quantum


def _round_up(x, m):
    return ((x + m - 1) // m) * m


def _critic_kernel(s_ref, a_ref, w_ref, b_ref, out_ref, *, dim_s, dim_a, dim_out):
    """Whole Critic forward (5 Linear layers, 4 ReLUs) on one batch tile.

    w_ref : (6, 128, 128) packed/zero-padded weights
            slot 0: rows of W1 multiplying `s`   (first dim_s rows used)
            slot 1: rows of W1 multiplying `a`   (first dim_a rows used)
            slot 2..5: W2..W5, each padded to 128x128
    b_ref : (5, 8, 128) biases, bias of layer l stored at [l, 0, :]
    """
    s = s_ref[...]                       # (TB, dim_s)
    a = a_ref[...]                       # (TB, dim_a)

    # Layer 1: concat folded into a split matmul (no wrapper-side concatenate).
    h = (jnp.dot(s, w_ref[0][:dim_s, :], preferred_element_type=jnp.float32)
         + jnp.dot(a, w_ref[1][:dim_a, :], preferred_element_type=jnp.float32)
         + b_ref[0][0:1, :])
    h = jnp.maximum(h, 0.0)              # (TB, 128); cols >= 50 are exactly 0

    # Layers 2..4: full 128x128 padded matmuls + ReLU (zero padding is inert).
    for l in (2, 3, 4):
        h = jnp.dot(h, w_ref[l], preferred_element_type=jnp.float32) + b_ref[l - 1][0:1, :]
        h = jnp.maximum(h, 0.0)

    # Layer 5: no ReLU.
    y = jnp.dot(h, w_ref[5], preferred_element_type=jnp.float32) + b_ref[4][0:1, :]
    out_ref[...] = y[:, :dim_out].astype(out_ref.dtype)


def init_critic_params(key, dim_input, dim_output):
    """PyTorch-default-style init: U[-1/sqrt(fan_in), +1/sqrt(fan_in)].

    Weights are stored (in_features, out_features); biases 1-D (out_features,).
    """
    sizes = [(dim_input, H_LAYER1),
             (H_LAYER1, H_LAYER2),
             (H_LAYER2, H_LAYER3),
             (H_LAYER3, H_LAYER4),
             (H_LAYER4, dim_output)]
    params = []
    for fan_in, fan_out in sizes:
        key, kw, kb = jax.random.split(key, 3)
        bound = 1.0 / float(fan_in) ** 0.5
        w = jax.random.uniform(kw, (fan_in, fan_out), jnp.float32, -bound, bound)
        b = jax.random.uniform(kb, (fan_out,), jnp.float32, -bound, bound)
        params.append((w, b))
    return params


def pack_critic_params(params, dim_s):
    """One-time packing of all weights/biases into two TPU-tile-aligned slabs."""
    w1, _ = params[0]
    w_slab = jnp.zeros((6, _LANE, _LANE), jnp.float32)
    w_slab = w_slab.at[0, :dim_s, :w1.shape[1]].set(w1[:dim_s, :])
    w_slab = w_slab.at[1, :w1.shape[0] - dim_s, :w1.shape[1]].set(w1[dim_s:, :])
    for slot, (w, _) in zip((2, 3, 4, 5), params[1:]):
        w_slab = w_slab.at[slot, :w.shape[0], :w.shape[1]].set(w)

    b_slab = jnp.zeros((5, _SUB, _LANE), jnp.float32)
    for l, (_, b) in enumerate(params):
        b_slab = b_slab.at[l, 0, :b.shape[0]].set(b)
    return w_slab, b_slab


@functools.partial(jax.jit, static_argnames=("dim_output",))
def critic_forward(s, a, w_slab, b_slab, dim_output):
    s = s.astype(jnp.float32)
    a = a.astype(jnp.float32)
    batch, dim_s = s.shape
    dim_a = a.shape[1]

    # Batch tile: whole (sublane-rounded) batch for small inputs, 256-row tiles
    # for realistic replay batches so the grid pipelines / shards across cores.
    tb = 256 if batch >= 256 else _round_up(batch, _SUB)
    b_pad = _round_up(batch, tb)
    if b_pad != batch:
        s = jnp.pad(s, ((0, b_pad - batch), (0, 0)))
        a = jnp.pad(a, ((0, b_pad - batch), (0, 0)))

    grid = (b_pad // tb,)
    kernel = functools.partial(_critic_kernel, dim_s=dim_s, dim_a=dim_a,
                               dim_out=dim_output)

    flops = 2 * b_pad * (dim_s * H_LAYER1 + dim_a * H_LAYER1
                         + H_LAYER1 * H_LAYER2 + H_LAYER2 * H_LAYER3
                         + H_LAYER3 * H_LAYER4 + H_LAYER4 * dim_output)
    bytes_accessed = 4 * (s.size + a.size + w_slab.size + b_slab.size
                          + b_pad * dim_output)

    out = pl.pallas_call(
        kernel,
        out_shape=jax.ShapeDtypeStruct((b_pad, dim_output), jnp.float32),
        grid_spec=pltpu.PrefetchScalarGridSpec(
            num_scalar_prefetch=0,
            grid=grid,
            in_specs=[
                pl.BlockSpec((tb, dim_s), lambda i: (i, 0)),
                pl.BlockSpec((tb, dim_a), lambda i: (i, 0)),
                # Weight/bias slabs: constant block index -> stay resident in
                # VMEM across all grid iterations (no re-DMA per step).
                pl.BlockSpec((6, _LANE, _LANE), lambda i: (0, 0, 0)),
                pl.BlockSpec((5, _SUB, _LANE), lambda i: (0, 0, 0)),
            ],
            out_specs=pl.BlockSpec((tb, dim_output), lambda i: (i, 0)),
        ),
        compiler_params=pltpu.CompilerParams(
            dimension_semantics=("parallel",)),
        cost_estimate=pl.CostEstimate(flops=flops, transcendentals=0,
                                      bytes_accessed=bytes_accessed),
    )(s, a, w_slab, b_slab)

    if b_pad != batch:
        out = out[:batch]
    return out


def critic_reference(s, a, params):
    """Pure-JAX reference mirroring the PyTorch forward."""
    x = jnp.concatenate([s, a], axis=1).astype(jnp.float32)
    h = x
    for i, (w, b) in enumerate(params):
        h = h @ w + b
        if i < len(params) - 1:
            h = jnp.maximum(h, 0.0)
    return h


if __name__ == "__main__":
    # Mountain-cart sized problem: state dim 2, action dim 1 -> dim_input = 3.
    batch = 8
    dim_s, dim_a = 2, 1
    dim_input = dim_s + dim_a
    dim_output = 1

    key = jax.random.PRNGKey(0)
    key, ks, ka, kp = jax.random.split(key, 4)

    s = jax.random.normal(ks, (batch, dim_s), jnp.float32)
    a = jax.random.normal(ka, (batch, dim_a), jnp.float32)
    params = init_critic_params(kp, dim_input, dim_output)
    w_slab, b_slab = pack_critic_params(params, dim_s)

    y = critic_forward(s, a, w_slab, b_slab, dim_output)
    y = jax.block_until_ready(y)

    y_ref = critic_reference(s, a, params)
    assert y.shape == (batch, dim_output), y.shape
    assert jnp.allclose(y, y_ref, atol=1e-5, rtol=1e-5), (y, y_ref)

    print("KERNEL_OK")
</pallas_src>

<mosaic_0001>
module attributes {stable_mosaic.version = 11 : i64} {
  func.func @_critic_kernel(%arg0: i32, %arg1: memref<8x2xf32, #tpu.memory_space<vmem>>, %arg2: memref<8x1xf32, #tpu.memory_space<vmem>>, %arg3: memref<6x128x128xf32, #tpu.memory_space<vmem>>, %arg4: memref<5x8x128xf32, #tpu.memory_space<vmem>>, %arg5: memref<8x1xf32, #tpu.memory_space<vmem>>) attributes {dimension_semantics = [#tpu.dimension_semantics<parallel>], iteration_bounds = array<i64: 1>, scalar_prefetch = 0 : i64, scratch_operands = 0 : i64, tpu.core_type = #tpu.core_type<tc>, window_params = [{transform_indices = @transform_0, window_bounds = array<i64: 8, 2>}, {transform_indices = @transform_1, window_bounds = array<i64: 8, 1>}, {pipeline_mode = #tpu.pipeline_mode<synchronous>, transform_indices = @transform_2, window_bounds = array<i64: 6, 128, 128>}, {pipeline_mode = #tpu.pipeline_mode<synchronous>, transform_indices = @transform_3, window_bounds = array<i64: 5, 8, 128>}, {transform_indices = @transform_4, window_bounds = array<i64: 8, 1>}]} {
    %c0 = arith.constant 0 : index
    %c0_0 = arith.constant 0 : index
    %0 = vector.load %arg1[%c0, %c0_0] : memref<8x2xf32, #tpu.memory_space<vmem>>, vector<8x2xf32>
    %c0_1 = arith.constant 0 : index
    %c0_2 = arith.constant 0 : index
    %1 = vector.load %arg2[%c0_1, %c0_2] : memref<8x1xf32, #tpu.memory_space<vmem>>, vector<8x1xf32>
    %c0_3 = arith.constant 0 : index
    %c0_4 = arith.constant 0 : index
    %c0_5 = arith.constant 0 : index
    %2 = vector.load %arg3[%c0_3, %c0_4, %c0_5] : memref<6x128x128xf32, #tpu.memory_space<vmem>>, vector<1x128x128xf32>
    %3 = vector.shape_cast %2 : vector<1x128x128xf32> to vector<128x128xf32>
    %4 = vector.extract_strided_slice %3 {offsets = [0, 0], sizes = [2, 128], strides = [1, 1]} : vector<128x128xf32> to vector<2x128xf32>
    %cst = arith.constant dense<0.000000e+00> : vector<8x128xf32>
    %5 = tpu.matmul %0, %4, %cst {dimension_numbers = #tpu.dot_dimension_numbers<[1], [0], [0], [1], [0, 0, 1, 1], [], []>} : vector<8x2xf32>, vector<2x128xf32>, vector<8x128xf32> -> vector<8x128xf32>
    %c1 = arith.constant 1 : index
    %c0_6 = arith.constant 0 : index
    %c0_7 = arith.constant 0 : index
    %6 = vector.load %arg3[%c1, %c0_6, %c0_7] : memref<6x128x128xf32, #tpu.memory_space<vmem>>, vector<1x128x128xf32>
    %7 = vector.shape_cast %6 : vector<1x128x128xf32> to vector<128x128xf32>
    %8 = vector.extract_strided_slice %7 {offsets = [0, 0], sizes = [1, 128], strides = [1, 1]} : vector<128x128xf32> to vector<1x128xf32>
    %cst_8 = arith.constant dense<0.000000e+00> : vector<8x128xf32>
    %9 = tpu.matmul %1, %8, %cst_8 {dimension_numbers = #tpu.dot_dimension_numbers<[1], [0], [0], [1], [0, 0, 1, 1], [], []>} : vector<8x1xf32>, vector<1x128xf32>, vector<8x128xf32> -> vector<8x128xf32>
    %10 = arith.addf %5, %9 : vector<8x128xf32>
    %c0_9 = arith.constant 0 : index
    %c0_10 = arith.constant 0 : index
    %c0_11 = arith.constant 0 : index
    %11 = vector.load %arg4[%c0_9, %c0_10, %c0_11] : memref<5x8x128xf32, #tpu.memory_space<vmem>>, vector<1x8x128xf32>
    %12 = vector.shape_cast %11 : vector<1x8x128xf32> to vector<8x128xf32>
    %13 = vector.extract_strided_slice %12 {offsets = [0, 0], sizes = [1, 128], strides = [1, 1]} : vector<8x128xf32> to vector<1x128xf32>
    %14 = vector.broadcast %13 : vector<1x128xf32> to vector<8x128xf32>
    %15 = arith.addf %10, %14 : vector<8x128xf32>
    %cst_12 = arith.constant 0.000000e+00 : f32
    %16 = vector.broadcast %cst_12 : f32 to vector<8x128xf32>
    %17 = arith.maximumf %15, %16 : vector<8x128xf32>
    %c2 = arith.constant 2 : index
    %c0_13 = arith.constant 0 : index
    %c0_14 = arith.constant 0 : index
    %18 = vector.load %arg3[%c2, %c0_13, %c0_14] : memref<6x128x128xf32, #tpu.memory_space<vmem>>, vector<1x128x128xf32>
    %19 = vector.shape_cast %18 : vector<1x128x128xf32> to vector<128x128xf32>
    %cst_15 = arith.constant dense<0.000000e+00> : vector<8x128xf32>
    %20 = tpu.matmul %17, %19, %cst_15 {dimension_numbers = #tpu.dot_dimension_numbers<[1], [0], [0], [1], [0, 0, 1, 1], [], []>} : vector<8x128xf32>, vector<128x128xf32>, vector<8x128xf32> -> vector<8x128xf32>
    %c1_16 = arith.constant 1 : index
    %c0_17 = arith.constant 0 : index
    %c0_18 = arith.constant 0 : index
    %21 = vector.load %arg4[%c1_16, %c0_17, %c0_18] : memref<5x8x128xf32, #tpu.memory_space<vmem>>, vector<1x8x128xf32>
    %22 = vector.shape_cast %21 : vector<1x8x128xf32> to vector<8x128xf32>
    %23 = vector.extract_strided_slice %22 {offsets = [0, 0], sizes = [1, 128], strides = [1, 1]} : vector<8x128xf32> to vector<1x128xf32>
    %24 = vector.broadcast %23 : vector<1x128xf32> to vector<8x128xf32>
    %25 = arith.addf %20, %24 : vector<8x128xf32>
    %cst_19 = arith.constant 0.000000e+00 : f32
    %26 = vector.broadcast %cst_19 : f32 to vector<8x128xf32>
    %27 = arith.maximumf %25, %26 : vector<8x128xf32>
    %c3 = arith.constant 3 : index
    %c0_20 = arith.constant 0 : index
    %c0_21 = arith.constant 0 : index
    %28 = vector.load %arg3[%c3, %c0_20, %c0_21] : memref<6x128x128xf32, #tpu.memory_space<vmem>>, vector<1x128x128xf32>
    %29 = vector.shape_cast %28 : vector<1x128x128xf32> to vector<128x128xf32>
    %cst_22 = arith.constant dense<0.000000e+00> : vector<8x128xf32>
    %30 = tpu.matmul %27, %29, %cst_22 {dimension_numbers = #tpu.dot_dimension_numbers<[1], [0], [0], [1], [0, 0, 1, 1], [], []>} : vector<8x128xf32>, vector<128x128xf32>, vector<8x128xf32> -> vector<8x128xf32>
    %c2_23 = arith.constant 2 : index
    %c0_24 = arith.constant 0 : index
    %c0_25 = arith.constant 0 : index
    %31 = vector.load %arg4[%c2_23, %c0_24, %c0_25] : memref<5x8x128xf32, #tpu.memory_space<vmem>>, vector<1x8x128xf32>
    %32 = vector.shape_cast %31 : vector<1x8x128xf32> to vector<8x128xf32>
    %33 = vector.extract_strided_slice %32 {offsets = [0, 0], sizes = [1, 128], strides = [1, 1]} : vector<8x128xf32> to vector<1x128xf32>
    %34 = vector.broadcast %33 : vector<1x128xf32> to vector<8x128xf32>
    %35 = arith.addf %30, %34 : vector<8x128xf32>
    %cst_26 = arith.constant 0.000000e+00 : f32
    %36 = vector.broadcast %cst_26 : f32 to vector<8x128xf32>
    %37 = arith.maximumf %35, %36 : vector<8x128xf32>
    %c4 = arith.constant 4 : index
    %c0_27 = arith.constant 0 : index
    %c0_28 = arith.constant 0 : index
    %38 = vector.load %arg3[%c4, %c0_27, %c0_28] : memref<6x128x128xf32, #tpu.memory_space<vmem>>, vector<1x128x128xf32>
    %39 = vector.shape_cast %38 : vector<1x128x128xf32> to vector<128x128xf32>
    %cst_29 = arith.constant dense<0.000000e+00> : vector<8x128xf32>
    %40 = tpu.matmul %37, %39, %cst_29 {dimension_numbers = #tpu.dot_dimension_numbers<[1], [0], [0], [1], [0, 0, 1, 1], [], []>} : vector<8x128xf32>, vector<128x128xf32>, vector<8x128xf32> -> vector<8x128xf32>
    %c3_30 = arith.constant 3 : index
    %c0_31 = arith.constant 0 : index
    %c0_32 = arith.constant 0 : index
    %41 = vector.load %arg4[%c3_30, %c0_31, %c0_32] : memref<5x8x128xf32, #tpu.memory_space<vmem>>, vector<1x8x128xf32>
    %42 = vector.shape_cast %41 : vector<1x8x128xf32> to vector<8x128xf32>
    %43 = vector.extract_strided_slice %42 {offsets = [0, 0], sizes = [1, 128], strides = [1, 1]} : vector<8x128xf32> to vector<1x128xf32>
    %44 = vector.broadcast %43 : vector<1x128xf32> to vector<8x128xf32>
    %45 = arith.addf %40, %44 : vector<8x128xf32>
    %cst_33 = arith.constant 0.000000e+00 : f32
    %46 = vector.broadcast %cst_33 : f32 to vector<8x128xf32>
    %47 = arith.maximumf %45, %46 : vector<8x128xf32>
    %c5 = arith.constant 5 : index
    %c0_34 = arith.constant 0 : index
    %c0_35 = arith.constant 0 : index
    %48 = vector.load %arg3[%c5, %c0_34, %c0_35] : memref<6x128x128xf32, #tpu.memory_space<vmem>>, vector<1x128x128xf32>
    %49 = vector.shape_cast %48 : vector<1x128x128xf32> to vector<128x128xf32>
    %cst_36 = arith.constant dense<0.000000e+00> : vector<8x128xf32>
    %50 = tpu.matmul %47, %49, %cst_36 {dimension_numbers = #tpu.dot_dimension_numbers<[1], [0], [0], [1], [0, 0, 1, 1], [], []>} : vector<8x128xf32>, vector<128x128xf32>, vector<8x128xf32> -> vector<8x128xf32>
    %c4_37 = arith.constant 4 : index
    %c0_38 = arith.constant 0 : index
    %c0_39 = arith.constant 0 : index
    %51 = vector.load %arg4[%c4_37, %c0_38, %c0_39] : memref<5x8x128xf32, #tpu.memory_space<vmem>>, vector<1x8x128xf32>
    %52 = vector.shape_cast %51 : vector<1x8x128xf32> to vector<8x128xf32>
    %53 = vector.extract_strided_slice %52 {offsets = [0, 0], sizes = [1, 128], strides = [1, 1]} : vector<8x128xf32> to vector<1x128xf32>
    %54 = vector.broadcast %53 : vector<1x128xf32> to vector<8x128xf32>
    %55 = arith.addf %50, %54 : vector<8x128xf32>
    %56 = vector.extract_strided_slice %55 {offsets = [0, 0], sizes = [8, 1], strides = [1, 1]} : vector<8x128xf32> to vector<8x1xf32>
    %c0_40 = arith.constant 0 : index
    %c0_41 = arith.constant 0 : index
    %57 = vector.load %arg5[%c0_40, %c0_41] : memref<8x1xf32, #tpu.memory_space<vmem>>, vector<8x1xf32>
    tpu.vector_store %arg5[%c0_40, %c0_41], %56 {strides = array<i32>} : memref<8x1xf32, #tpu.memory_space<vmem>>, vector<8x1xf32>,
    return
  }
  func.func @transform_0(%arg0: i32) -> (i32, i32) {
    %c0_i32 = arith.constant 0 : i32
    %c0_i32_0 = arith.constant 0 : i32
    return %arg0, %c0_i32 : i32, i32
  }
  func.func @transform_1(%arg0: i32) -> (i32, i32) {
    %c0_i32 = arith.constant 0 : i32
    %c0_i32_0 = arith.constant 0 : i32
    return %arg0, %c0_i32 : i32, i32
  }
  func.func @transform_2(%arg0: i32) -> (i32, i32, i32) {
    %c0_i32 = arith.constant 0 : i32
    %c0_i32_0 = arith.constant 0 : i32
    %c0_i32_1 = arith.constant 0 : i32
    %c0_i32_2 = arith.constant 0 : i32
    return %c0_i32, %c0_i32_0, %c0_i32_1 : i32, i32, i32
  }
  func.func @transform_3(%arg0: i32) -> (i32, i32, i32) {
    %c0_i32 = arith.constant 0 : i32
    %c0_i32_0 = arith.constant 0 : i32
    %c0_i32_1 = arith.constant 0 : i32
    %c0_i32_2 = arith.constant 0 : i32
    return %c0_i32, %c0_i32_0, %c0_i32_1 : i32, i32, i32
  }
  func.func @transform_4(%arg0: i32) -> (i32, i32) {
    %c0_i32 = arith.constant 0 : i32
    %c0_i32_0 = arith.constant 0 : i32
    return %arg0, %c0_i32 : i32, i32
  }
}

</mosaic_0001>

<bundles_post_ra>
// kernel: critic_forward.1
= control target key start
LH: loop header
LB: loop body
LE: loop exit
PB: predicated region body
PF: predicated region fallthrough
CT: control target
= control target key end

     0   :  { %9 = vsyncpa [#allocation3], 0  ;;  %s390_s0 = inlined_call_operand.vmem [shape: f32[8,2], index: 0, kind: input, shape index: {}]   ;;  %s391_s1 = inlined_call_operand.vmem [shape: f32[8,1], index: 1, kind: input, shape index: {}]   ;;  %s392_s2 = inlined_call_operand.hbm [shape: f32[6,128,128], index: 2, kind: input, shape index: {}]   ;;  %s393_s3 = inlined_call_operand.hbm [shape: f32[5,8,128], index: 3, kind: input, shape index: {}]   ;;  %s394_s4 = inlined_call_operand.vmem [shape: f32[8,1], index: 4, kind: output, shape index: {}]  }
   0x1   :  { %s19_s17 = sshll.u32 %s392_s2, 4  ;;  %s20_s17 = int_to_ptr.hbm [resolvable:$true] %s19_s17 }
   0x2   :  { %10 = vsyncpa [#allocation5], 0  ;;  %s344_s18 = smov [#allocation2]   ;;  %s32_s22 = sshll.u32 %s393_s3, 4  ;;  %s33_s22 = int_to_ptr.hbm [resolvable:$true] %s32_s22 }
   0x3   :  { %s21_s19 = sshll.u32 %s344_s18, 4  ;;  %s345_s23 = smov 128   ;;  %s22_s19 = int_to_ptr.vmem [resolvable:$true] %s21_s19 }
   0x4   :  { %s346_s24 = smov 8   ;;  %s347_s25 = smov [#allocation4]  }
   0x5   :  { %27 = dma.hbm_to_vmem [thread:$0]  %s20_s17, 12288, %s22_s19, [#allocation3], %s345_s23, %s345_s23, %s346_s24  }
   0x6   :  { %s34_s26 = sshll.u32 %s347_s25, 4  ;;  %s35_s26 = int_to_ptr.vmem [resolvable:$true] %s34_s26 }
   0x7   :  { %40 = dma.hbm_to_vmem [thread:$0]  %s33_s22, 640, %s35_s26, [#allocation5], %s345_s23, %s345_s23, %s346_s24  }
   0x8   :  { %340 = dma.done.wait [#allocation3], 12288  }
   0x9   :  { %341 = vsyncadd [#allocation3], 4294955008 }
   0xa   :  { %342 = dma.done.wait [#allocation5], 640  }
   0xb   :  { %343 = vsyncadd [#allocation5], 4294966656  ;;  %vm58_vm0 = vcmask 1040384   ;;  %vm86_vm1 = vcmask 1041408   ;;  %vm54_vm2 = vcmask 7168   ;;  %vm82_vm3 = vcmask 15360  }
   0xc   :  { %v53_v0 = vld [vmem:[#allocation2 + $0x80] sm:$0xff]  ;;  %v130_v4 = vld [vmem:[#allocation2 + $0x178] sm:$0xff]  ;;  %v129_v5 = vld [vmem:[#allocation2 + $0x170] sm:$0xff] }
   0xd   :  { %v51_v1 = vld [vmem:[#allocation2] sm:$0xff]  ;;  %284 = vmatpush.msk.msra.mxu0 %vm58_vm0, %v53_v0  ;;  %134 = vmatpush.msra.mxu2 %v130_v4  ;;  %v128_v6 = vld [vmem:[#allocation2 + $0x168] sm:$0xff]  ;;  %v126_v8 = vld [vmem:[#allocation2 + $0x158] sm:$0xff] }
   0xe   :  { %v50_v2 = vld [vmem:[%s391_s1] sm:$0xff]  ;;  %286 = vmatpush.msk.msra.mxu1 %vm86_vm1, %v51_v1  ;;  %v125_v9 = vld [vmem:[#allocation2 + $0x150] sm:$0xff]  ;;  %v124_v10 = vld [vmem:[#allocation2 + $0x148] sm:$0xff] }
   0xf   :  { %v49_v3 = vld [vmem:[%s390_s0] sm:$0xff]  ;;  %285 = vmatmul.msk.f32.vlgmr.msra.gmra.mxu0 %vm54_vm2, %v50_v2  ;;  %135 = vmatpush.msra.mxu2 %v129_v5  ;;  %v122_v12 = vld [vmem:[#allocation2 + $0x138] sm:$0xff]  ;;  %v121_v13 = vld [vmem:[#allocation2 + $0x130] sm:$0xff] }
  0x10   :  { %287 = vmatmul.msk.f32.vlgmr.msra.gmra.mxu1 %vm82_vm3, %v49_v3  ;;  %v127_v7 = vld [vmem:[#allocation2 + $0x160] sm:$0xff]  ;;  %v120_v14 = vld [vmem:[#allocation2 + $0x128] sm:$0xff]  ;;  %v118_v16 = vld [vmem:[#allocation2 + $0x118] sm:$0xff] }
  0x11   :  { %136 = vmatpush.msra.mxu2 %v128_v6  ;;  %v123_v11 = vld [vmem:[#allocation2 + $0x140] sm:$0xff]  ;;  %v117_v17 = vld [vmem:[#allocation2 + $0x110] sm:$0xff]  ;;  %v116_v18 = vld [vmem:[#allocation2 + $0x108] sm:$0xff] }
  0x12   :  { %v119_v15 = vld [vmem:[#allocation2 + $0x120] sm:$0xff]  ;;  %v171_v20 = vld [vmem:[#allocation2 + $0x1f8] sm:$0xff]  ;;  %v170_v21 = vld [vmem:[#allocation2 + $0x1f0] sm:$0xff] }
  0x13   :  { %137 = vmatpush.msra.mxu2 %v127_v7  ;;  %v115_v19 = vld [vmem:[#allocation2 + $0x100] sm:$0xff]  ;;  %175 = vmatpush.msra.mxu3 %v171_v20  ;;  %v169_v22 = vld [vmem:[#allocation2 + $0x1e8] sm:$0xff]  ;;  %v167_v24 = vld [vmem:[#allocation2 + $0x1d8] sm:$0xff] }
  0x14   :  { %v168_v23 = vld [vmem:[#allocation2 + $0x1e0] sm:$0xff]  ;;  %v166_v25 = vld [vmem:[#allocation2 + $0x1d0] sm:$0xff]  ;;  %v165_v26 = vld [vmem:[#allocation2 + $0x1c8] sm:$0xff] }
  0x15   :  { %138 = vmatpush.msra.mxu2 %v126_v8  ;;  %176 = vmatpush.msra.mxu3 %v170_v21  ;;  %v164_v27 = vld [vmem:[#allocation2 + $0x1c0] sm:$0xff]  ;;  %v163_v28 = vld [vmem:[#allocation2 + $0x1b8] sm:$0xff]  ;;  %v162_v29 = vld [vmem:[#allocation2 + $0x1b0] sm:$0xff] }
  0x16   :  { %v161_v30 = vld [vmem:[#allocation2 + $0x1a8] sm:$0xff]  ;;  %v160_v31 = vld [vmem:[#allocation2 + $0x1a0] sm:$0xff]  ;;  %v159_v33 = vld [vmem:[#allocation2 + $0x198] sm:$0xff] }
  0x17   :  { %139 = vmatpush.msra.mxu2 %v125_v9  ;;  %177 = vmatpush.msra.mxu3 %v169_v22  ;;  %v110_v32 = vld [vmem:[#allocation4] sm:$0xff]  ;;  %v158_v40 = vld [vmem:[#allocation2 + $0x190] sm:$0xff]  ;;  %v157_v41 = vld [vmem:[#allocation2 + $0x188] sm:$0xff] }
  0x18   :  { %v111_v34 = vperm.slane %v110_v32, 0  ;;  %v156_v42 = vld [vmem:[#allocation2 + $0x180] sm:$0xff]  ;;  %v212_v43 = vld [vmem:[#allocation2 + $0x278] sm:$0xff]  ;;  %v211_v44 = vld [vmem:[#allocation2 + $0x270] sm:$0xff] }
  0x19   :  { %140 = vmatpush.msra.mxu2 %v124_v10  ;;  %178 = vmatpush.msra.mxu3 %v168_v23  ;;  %v210_v45 = vld [vmem:[#allocation2 + $0x268] sm:$0xff]  ;;  %v209_v46 = vld [vmem:[#allocation2 + $0x260] sm:$0xff]  ;;  %v208_v47 = vld [vmem:[#allocation2 + $0x258] sm:$0xff] }
  0x1a   :  { %216 = vmatpush.msrb.mxu0 %v212_v43  ;;  %v207_v48 = vld [vmem:[#allocation2 + $0x250] sm:$0xff]  ;;  %v206_v49 = vld [vmem:[#allocation2 + $0x248] sm:$0xff]  ;;  %v205_v50 = vld [vmem:[#allocation2 + $0x240] sm:$0xff] }
  0x1b   :  { %141 = vmatpush.msra.mxu2 %v123_v11  ;;  %179 = vmatpush.msra.mxu3 %v167_v24  ;;  %v204_v51 = vld [vmem:[#allocation2 + $0x238] sm:$0xff]  ;;  %v203_v52 = vld [vmem:[#allocation2 + $0x230] sm:$0xff]  ;;  %v202_v53 = vld [vmem:[#allocation2 + $0x228] sm:$0xff] }
  0x1c   :  { %217 = vmatpush.msrb.mxu0 %v211_v44  ;;  %v201_v54 = vld [vmem:[#allocation2 + $0x220] sm:$0xff]  ;;  %v132_v55 = vld [vmem:[#allocation4 + $0x8] sm:$0xff]  ;;  %v200_v56 = vld [vmem:[#allocation2 + $0x218] sm:$0xff] }
  0x1d   :  { %142 = vmatpush.msra.mxu2 %v122_v12  ;;  %180 = vmatpush.msra.mxu3 %v166_v25  ;;  %v133_v57 = vperm.slane %v132_v55, 0  ;;  %v199_v61 = vld [vmem:[#allocation2 + $0x210] sm:$0xff]  ;;  %v198_v62 = vld [vmem:[#allocation2 + $0x208] sm:$0xff]  ;;  %v197_v63 = vld [vmem:[#allocation2 + $0x200] sm:$0xff] }
  0x1e   :  { %218 = vmatpush.msrb.mxu0 %v210_v45  ;;  %v253_v0 = vld [vmem:[#allocation2 + $0x2f8] sm:$0xff]  ;;  %v252_v1 = vld [vmem:[#allocation2 + $0x2f0] sm:$0xff]  ;;  %v251_v2 = vld [vmem:[#allocation2 + $0x2e8] sm:$0xff] }
  0x1f   :  { %143 = vmatpush.msra.mxu2 %v121_v13  ;;  %181 = vmatpush.msra.mxu3 %v165_v26  ;;  %v250_v3 = vld [vmem:[#allocation2 + $0x2e0] sm:$0xff]  ;;  %v249_v4 = vld [vmem:[#allocation2 + $0x2d8] sm:$0xff]  ;;  %v248_v5 = vld [vmem:[#allocation2 + $0x2d0] sm:$0xff] }
  0x20   :  { %219 = vmatpush.msrb.mxu0 %v209_v46  ;;  %257 = vmatpush.msrb.mxu1 %v253_v0  ;;  %v247_v6 = vld [vmem:[#allocation2 + $0x2c8] sm:$0xff]  ;;  %v246_v7 = vld [vmem:[#allocation2 + $0x2c0] sm:$0xff]  ;;  %v245_v8 = vld [vmem:[#allocation2 + $0x2b8] sm:$0xff] }
  0x21   :  { %144 = vmatpush.msra.mxu2 %v120_v14  ;;  %182 = vmatpush.msra.mxu3 %v164_v27  ;;  %v244_v9 = vld [vmem:[#allocation2 + $0x2b0] sm:$0xff]  ;;  %v243_v10 = vld [vmem:[#allocation2 + $0x2a8] sm:$0xff]  ;;  %v242_v11 = vld [vmem:[#allocation2 + $0x2a0] sm:$0xff] }
  0x22   :  { %220 = vmatpush.msrb.mxu0 %v208_v47  ;;  %258 = vmatpush.msrb.mxu1 %v252_v1  ;;  %v173_v12 = vld [vmem:[#allocation4 + $0x10] sm:$0xff]  ;;  %v241_v13 = vld [vmem:[#allocation2 + $0x298] sm:$0xff]  ;;  %v238_v20 = vld [vmem:[#allocation2 + $0x280] sm:$0xff] }
  0x23   :  { %145 = vmatpush.msra.mxu2 %v119_v15  ;;  %183 = vmatpush.msra.mxu3 %v163_v28  ;;  %v174_v14 = vperm.slane %v173_v12, 0  ;;  %v214_v21 = vld [vmem:[#allocation4 + $0x18] sm:$0xff]  ;;  %v255_v26 = vld [vmem:[#allocation4 + $0x20] sm:$0xff] }
  0x24   :  { %221 = vmatpush.msrb.mxu0 %v207_v48  ;;  %259 = vmatpush.msrb.mxu1 %v251_v2  ;;  %v215_v22 = vperm.slane %v214_v21, 0  ;;  %v256_v27 = vperm.slane %v255_v26, 0 }
  0x25   :  { %146 = vmatpush.msra.mxu2 %v118_v16  ;;  %184 = vmatpush.msra.mxu3 %v162_v29 }
  0x26   :  { %222 = vmatpush.msrb.mxu0 %v206_v49  ;;  %260 = vmatpush.msrb.mxu1 %v250_v3 }
  0x27   :  { %147 = vmatpush.msra.mxu2 %v117_v17  ;;  %185 = vmatpush.msra.mxu3 %v161_v30 }
  0x28   :  { %223 = vmatpush.msrb.mxu0 %v205_v50  ;;  %261 = vmatpush.msrb.mxu1 %v249_v4 }
  0x29   :  { %148 = vmatpush.msra.mxu2 %v116_v18  ;;  %186 = vmatpush.msra.mxu3 %v160_v31  ;;  %v240_v18 = vld [vmem:[#allocation2 + $0x290] sm:$0xff] }
  0x2a   :  { %224 = vmatpush.msrb.mxu0 %v204_v51  ;;  %262 = vmatpush.msrb.mxu1 %v248_v5 }
  0x2b   :  { %149 = vmatpush.msra.mxu2 %v115_v19  ;;  %187 = vmatpush.msra.mxu3 %v159_v33  ;;  %v239_v19 = vld [vmem:[#allocation2 + $0x288] sm:$0xff] }
  0x2c   :  { %225 = vmatpush.msrb.mxu0 %v203_v52  ;;  %263 = vmatpush.msrb.mxu1 %v247_v6 }
  0x2d   :  { %188 = vmatpush.msra.mxu3 %v158_v40 }
  0x2e   :  { %226 = vmatpush.msrb.mxu0 %v202_v53  ;;  %264 = vmatpush.msrb.mxu1 %v246_v7 }
  0x2f   :  { %189 = vmatpush.msra.mxu3 %v157_v41 }
  0x30   :  { %227 = vmatpush.msrb.mxu0 %v201_v54  ;;  %265 = vmatpush.msrb.mxu1 %v245_v8 }
  0x31   :  { %190 = vmatpush.msra.mxu3 %v156_v42 }
  0x32   :  { %228 = vmatpush.msrb.mxu0 %v200_v56  ;;  %266 = vmatpush.msrb.mxu1 %v244_v9 }
  0x34   :  { %229 = vmatpush.msrb.mxu0 %v199_v61  ;;  %267 = vmatpush.msrb.mxu1 %v243_v10 }
  0x36   :  { %230 = vmatpush.msrb.mxu0 %v198_v62  ;;  %268 = vmatpush.msrb.mxu1 %v242_v11 }
  0x38   :  { %231 = vmatpush.msrb.mxu0 %v197_v63  ;;  %269 = vmatpush.msrb.mxu1 %v241_v13 }
  0x3a   :  { %270 = vmatpush.msrb.mxu1 %v240_v18 }
  0x3c   :  { %271 = vmatpush.msrb.mxu1 %v239_v19 }
  0x3e   :  { %272 = vmatpush.msrb.mxu1 %v238_v20 }
  0x8c   :  { %v79_v35 = vpop.f32.mrf.mxu0 }
  0x8d   :  { %v107_v36 = vpop.f32.mrf.mxu1 }
  0x8e   :  { %v108_v37 = vadd.f32 %v107_v36, %v79_v35 }
  0x90   :  { %v112_v38 = vadd.f32 %v111_v34, %v108_v37 }
  0x92   :  { %v113_v39 = vmax.f32 %v112_v38, 0.0 }
  0x94   :  { %150 = vmatmul.f32.vlgmr.msra.gmra.mxu2 %v113_v39 }
 0x117   :  { %v151_v58 = vpop.f32.mrf.mxu2 }
 0x118   :  { %v152_v59 = vadd.f32 %v151_v58, %v133_v57 }
 0x11a   :  { %v154_v60 = vmax.f32 %v152_v59, 0.0 }
 0x11c   :  { %191 = vmatmul.f32.vlgmr.msra.gmra.mxu3 %v154_v60 }
 0x19f   :  { %v192_v15 = vpop.f32.mrf.mxu3 }
 0x1a0   :  { %v193_v16 = vadd.f32 %v192_v15, %v174_v14 }
 0x1a2   :  { %v195_v17 = vmax.f32 %v193_v16, 0.0 }
 0x1a4   :  { %232 = vmatmul.f32.vlgmr.msrb.gmra.mxu0 %v195_v17 }
 0x221   :  { %v233_v23 = vpop.f32.mrf.mxu0 }
 0x222   :  { %v234_v24 = vadd.f32 %v233_v23, %v215_v22 }
 0x224   :  { %v236_v25 = vmax.f32 %v234_v24, 0.0 }
 0x226   :  { %273 = vmatmul.f32.vlgmr.msrb.gmra.mxu1 %v236_v25 }
 0x2a3   :  { %v274_v28 = vpop.f32.mrf.mxu1 }
 0x2a4   :  { %v275_v29 = vadd.f32 %v274_v28, %v256_v27 }
 0x2a6   :  { %277 = vst.msk [vmem:[%s394_s4] sm:$0xff] %vm54_vm2, %v275_v29 }
 0x2a7   :  { %282 = vsyncpa [#allocation3], 1 }
 0x2a8   :  { %283 = vsyncpa [#allocation5], 1 }

</bundles_post_ra>
